<compile_context>
chip_gen: v7x
topology: tpu7x:2x2x1
jax: 0.10.0
libtpu: 0.0.40
codegen_flags: <defaults>
</compile_context>

<pallas_src>
import functools

import jax
import jax.numpy as jnp
from jax.experimental import pallas as pl
from jax.experimental.pallas import tpu as pltpu

# Preferred lane widths for the 2-D view (widest first -> lane-dense stores).
_LANE_CANDIDATES = (1024, 512, 256, 128)
# Block size target in *elements*; f32-equivalent bytes = 4x this, so the VMEM
# footprint of the in-kernel f32 intermediates is independent of input dtype.
_TARGET_BLOCK_ELEMS = 1 << 20          # 1M elems -> ~4 MiB f32-equivalent / block
_VMEM_LIMIT_BYTES = 48 << 20           # explicit scoped-VMEM budget (< v7x 64 MiB)
_MAX_INT_POW = 32                      # repeated-squaring cap for the integer-b path


def _sublane_multiple(dtype) -> int:
    """Min sublane multiple for the dtype: 8 (f32), 16 (bf16/f16), 32 (int8/fp8)."""
    return max(8, 32 // jnp.dtype(dtype).itemsize)


def _int_pow(x, e: int):
    """x ** e for a static positive integer e via repeated squaring (VPU only)."""
    result = None
    cur = x
    while e > 0:
        if e & 1:
            result = cur if result is None else result * cur
        e >>= 1
        if e:
            cur = cur * cur
    return result


def _make_bell_kernel(a: float, b: float, c: float):
    """Build the Bell MF kernel with (a, b, c) baked in as constants."""
    inv_a = 1.0 / float(a)
    b = float(b)
    c = float(c)
    tiny = float(jnp.finfo(jnp.float32).tiny)
    int_b_fast_path = (b > 0.0) and b.is_integer() and (b <= _MAX_INT_POW)

    def kernel(x_ref, o_ref):
        xv = x_ref[...].astype(jnp.float32)        # compute in f32 in-register
        d = (xv - c) * inv_a
        dist = d * d
        if int_b_fast_path:
            p = _int_pow(dist, int(b))             # e.g. b=2 -> dist * dist
        else:
            # TODO(synk): general-b path assumes b > 0 (standard bell MF); torch's
            # 0**0 = 1 / 0**negative = inf semantics are not reproduced for b <= 0.
            p = jnp.exp(b * jnp.log(jnp.maximum(dist, tiny)))
            p = jnp.where(dist > 0.0, p, 0.0)
        # approx=False keeps full divide precision (approx vrcp can miss 1e-5 rtol).
        o_ref[...] = pl.reciprocal(1.0 + p, approx=False).astype(o_ref.dtype)

    return kernel


def bell_member_func(x: jax.Array, a: float, b: float, c: float) -> jax.Array:
    """Elementwise generalized-bell membership function via a Pallas TPU kernel."""
    if float(a) == 0.0:
        raise ValueError("BellMemberFunc: parameter `a` must be non-zero.")
    # TODO(synk): if a/b/c become trainable (ANFIS-style), pass them as SMEM
    # scalars / scalar-prefetch instead of closure constants to avoid retraces.

    orig_shape = x.shape
    dtype = x.dtype
    n = x.size
    flat = x.reshape(-1)

    kernel = _make_bell_kernel(a, b, c)
    compiler_params = pltpu.CompilerParams(
        dimension_semantics=("parallel",),
        vmem_limit_bytes=_VMEM_LIMIT_BYTES,
    )

    if n % 128 == 0:
        # Common case: lane-dense (rows, lanes) view, widest lane width that divides n.
        lanes = next(cand for cand in _LANE_CANDIDATES if n % cand == 0)
        rows = n // lanes
        x2d = flat.reshape(rows, lanes)
        sub = _sublane_multiple(dtype)
        target_rows = max(sub, (_TARGET_BLOCK_ELEMS // lanes) // sub * sub)
        # Single block when it fits (an extra serial grid step on single-TC chips
        # is pure overhead); otherwise ~4 MiB f32-equivalent, sublane-aligned blocks.
        block_rows = rows if rows <= target_rows else target_rows
        grid = (pl.cdiv(rows, block_rows),)
        in_spec = pl.BlockSpec((block_rows, lanes), lambda i: (i, 0))
        out_spec = pl.BlockSpec((block_rows, lanes), lambda i: (i, 0))
    else:
        # Odd-sized input: (1, n) view tiled along lanes; Pallas masks the partial
        # last block, so there is no pad / slice HBM pass.
        x2d = flat.reshape(1, n)
        block_lanes = n if n <= _TARGET_BLOCK_ELEMS else _TARGET_BLOCK_ELEMS
        grid = (pl.cdiv(n, block_lanes),)
        in_spec = pl.BlockSpec((1, block_lanes), lambda i: (0, i))
        out_spec = pl.BlockSpec((1, block_lanes), lambda i: (0, i))

    out2d = pl.pallas_call(
        kernel,
        out_shape=jax.ShapeDtypeStruct(x2d.shape, dtype),
        grid=grid,
        in_specs=[in_spec],
        out_specs=out_spec,
        compiler_params=compiler_params,
    )(x2d)

    return out2d.reshape(orig_shape)


if __name__ == "__main__":
    key = jax.random.PRNGKey(0)
    # Small NCHW-like input, consistent with an elementwise membership function.
    x = jax.random.normal(key, (2, 4, 16, 16), dtype=jnp.float32)

    # Deterministic module parameters (module __init__ takes scalar a, b, c).
    # TODO(synk): the PyTorch module's b_log_hook is a training-time gradient
    # hook; forward-only, so it has no Pallas equivalent here.
    a = 1.5
    b = 2.0
    c = 0.5

    fn = jax.jit(functools.partial(bell_member_func, a=a, b=b, c=c))
    out = jax.block_until_ready(fn(x))

    # Reference: same math as the PyTorch forward.
    dist = jnp.square((x - c) / a)
    ref = 1.0 / (1.0 + jnp.power(dist, b))

    assert out.shape == x.shape
    assert out.dtype == x.dtype
    assert jnp.allclose(out, ref, atol=1e-5, rtol=1e-5)

    print("KERNEL_OK")
</pallas_src>

<mosaic_0001>
module attributes {stable_mosaic.version = 11 : i64} {
  func.func @kernel(%arg0: i32, %arg1: memref<2x1024xf32, #tpu.memory_space<vmem>>, %arg2: memref<2x1024xf32, #tpu.memory_space<vmem>>) attributes {dimension_semantics = [#tpu.dimension_semantics<parallel>], iteration_bounds = array<i64: 1>, scalar_prefetch = 0 : i64, scratch_operands = 0 : i64, tpu.core_type = #tpu.core_type<tc>, window_params = [{transform_indices = @transform_0, window_bounds = array<i64: 2, 1024>}, {transform_indices = @transform_1, window_bounds = array<i64: 2, 1024>}]} {
    %c0 = arith.constant 0 : index
    %c0_0 = arith.constant 0 : index
    %0 = vector.load %arg1[%c0, %c0_0] : memref<2x1024xf32, #tpu.memory_space<vmem>>, vector<2x1024xf32>
    %cst = arith.constant 5.000000e-01 : f32
    %1 = vector.broadcast %cst : f32 to vector<2x1024xf32>
    %2 = arith.subf %0, %1 : vector<2x1024xf32>
    %cst_1 = arith.constant 0.666666686 : f32
    %3 = vector.broadcast %cst_1 : f32 to vector<2x1024xf32>
    %4 = arith.mulf %2, %3 : vector<2x1024xf32>
    %5 = arith.mulf %4, %4 : vector<2x1024xf32>
    %6 = arith.mulf %5, %5 : vector<2x1024xf32>
    %cst_2 = arith.constant 1.000000e+00 : f32
    %7 = vector.broadcast %cst_2 : f32 to vector<2x1024xf32>
    %8 = arith.addf %7, %6 : vector<2x1024xf32>
    %9 = tpu.reciprocal %8 : vector<2x1024xf32> -> vector<2x1024xf32>
    %c0_3 = arith.constant 0 : index
    %c0_4 = arith.constant 0 : index
    %10 = vector.load %arg2[%c0_3, %c0_4] : memref<2x1024xf32, #tpu.memory_space<vmem>>, vector<2x1024xf32>
    tpu.vector_store %arg2[%c0_3, %c0_4], %9 {strides = array<i32>} : memref<2x1024xf32, #tpu.memory_space<vmem>>, vector<2x1024xf32>,
    return
  }
  func.func @transform_0(%arg0: i32) -> (i32, i32) {
    %c0_i32 = arith.constant 0 : i32
    %c0_i32_0 = arith.constant 0 : i32
    return %arg0, %c0_i32 : i32, i32
  }
  func.func @transform_1(%arg0: i32) -> (i32, i32) {
    %c0_i32 = arith.constant 0 : i32
    %c0_i32_0 = arith.constant 0 : i32
    return %arg0, %c0_i32 : i32, i32
  }
}

</mosaic_0001>

<bundles_post_ra>
// kernel: bell_member_func.1
= control target key start
LH: loop header
LB: loop body
LE: loop exit
PB: predicated region body
PF: predicated region fallthrough
CT: control target
= control target key end

     0   :  { %s56_s0 = inlined_call_operand.vmem [shape: f32[2,1024], index: 0, kind: input, shape index: {}]   ;;  %s57_s1 = inlined_call_operand.vmem [shape: f32[2,1024], index: 1, kind: output, shape index: {}]  }
   0x1   :  { %v8_v0 = vld [vmem:[%s56_s0] sm:$0xff]  ;;  %v9_v1 = vld [vmem:[%s56_s0 + $0x8] sm:$0xff] }
   0x2   :  { %v28_v2 = vadd.f32 -0.5, %v8_v0  ;;  %v29_v3 = vadd.f32 -0.5, %v9_v1 }
   0x4   :  { %v12_v4 = vmul.f32 0.6666667, %v28_v2  ;;  %v13_v5 = vmul.f32 0.6666667, %v29_v3 }
   0x6   :  { %v14_v6 = vmul.f32 %v12_v4, %v12_v4  ;;  %v15_v7 = vmul.f32 %v13_v5, %v13_v5 }
   0x8   :  { %v16_v8 = vmul.f32 %v14_v6, %v14_v6  ;;  %v17_v9 = vmul.f32 %v15_v7, %v15_v7 }
   0xa   :  { %v18_v10 = vadd.f32 1.0, %v16_v8  ;;  %v19_v11 = vadd.f32 1.0, %v17_v9 }
   0xc   :  { %30 = vrcp.f32 %v18_v10 }
   0xd   :  { %32 = vrcp.f32 %v19_v11 }
  0x16   :  { %v31_v12 = vpop.eup %30 }
  0x17   :  { %v33_v13 = vpop.eup %32  ;;  %22 = vst [vmem:[%s57_s1] sm:$0xff] %v31_v12 }
  0x18   :  { %23 = vst [vmem:[%s57_s1 + $0x8] sm:$0xff] %v33_v13 }

</bundles_post_ra>
